<compile_context>
chip_gen: v6e
topology: v6e:2x2x1
jax: 0.10.0
libtpu: 0.0.40
codegen_flags: <defaults>
</compile_context>

<pallas_src>
import jax
import jax.numpy as jnp
from jax import lax
from jax.experimental import pallas as pl
from jax.experimental.pallas import tpu as pltpu

_LANES = 128           # vreg lane width
_SLAB_ROWS = 8         # one (8,128) f32 vreg per slab in the hot loop
_MAX_TILE_ROWS = 8192  # 8192 x 128 f32 = 4 MiB streamed per grid step
_UNROLL = 8            # fori_loop unroll factor for the hot loop
_PAD_VALUE = -100.0    # tanh(0.5 * -100) == -1.0 exactly -> sigmoid pad == 0.0


def _round_up(x, m):
    return ((x + m - 1) // m) * m


def _sigmoid1(x):
    # One EUP push per element (jax.nn.sigmoid may lower to exp + reciprocal).
    return 0.5 * jnp.tanh(0.5 * x) + 0.5


def _make_dice_kernel(rows, tile_rows, tiles_per_chunk, total_tiles):
    """All arguments are static Python ints."""
    n_slabs_full = tile_rows // _SLAB_ROWS
    r_last = rows - (total_tiles - 1) * tile_rows   # valid rows in final block
    last_is_ragged = r_last != tile_rows
    full_slabs_last = r_last // _SLAB_ROWS
    rem_rows_last = r_last % _SLAB_ROWS

    def accumulate(x_ref, n_slabs, carry):
        """Unmasked streaming loop over `n_slabs` full (8,128) slabs."""
        if n_slabs == 0:
            return carry

        def body(g, c):
            sq, s = c
            start = pl.multiple_of(g * _SLAB_ROWS, _SLAB_ROWS)
            xg = x_ref[pl.ds(start, _SLAB_ROWS), :].astype(jnp.float32)
            sg = _sigmoid1(xg)
            return (sq + sg * sg, s + sg)

        return lax.fori_loop(0, n_slabs, body, carry,
                             unroll=min(_UNROLL, n_slabs))

    def kernel(x_ref, o_ref, sq_acc, s_acc):
        c = pl.program_id(0)   # chunk index ("parallel")
        i = pl.program_id(1)   # tile within chunk ("arbitrary" / reduction)

        @pl.when(i == 0)
        def _init():
            sq_acc[...] = jnp.zeros_like(sq_acc)
            s_acc[...] = jnp.zeros_like(s_acc)

        block_idx = c * tiles_per_chunk + i
        zeros = (jnp.zeros((_SLAB_ROWS, _LANES), jnp.float32),
                 jnp.zeros((_SLAB_ROWS, _LANES), jnp.float32))

        if not last_is_ragged:
            # Every block is full: pure unmasked streaming.
            sq, s = accumulate(x_ref, n_slabs_full, zeros)
            sq_acc[...] += sq
            s_acc[...] += s
        else:
            is_last = block_idx == total_tiles - 1

            if total_tiles > 1:
                @pl.when(block_idx < total_tiles - 1)
                def _full_block():
                    sq, s = accumulate(x_ref, n_slabs_full, zeros)
                    sq_acc[...] += sq
                    s_acc[...] += s

            @pl.when(is_last)
            def _ragged_block():
                sq, s = accumulate(x_ref, full_slabs_last, zeros)
                if rem_rows_last:
                    # One statically row-masked slab; rows past `rows` are
                    # Pallas edge padding (unspecified data) and are zeroed.
                    start = full_slabs_last * _SLAB_ROWS
                    xg = x_ref[pl.ds(start, _SLAB_ROWS), :].astype(jnp.float32)
                    sg = _sigmoid1(xg)
                    row = lax.broadcasted_iota(
                        jnp.int32, (_SLAB_ROWS, _LANES), 0)
                    sg = jnp.where(row < rem_rows_last, sg, 0.0)
                    sq = sq + sg * sg
                    s = s + sg
                sq_acc[...] += sq
                s_acc[...] += s

        @pl.when(i == tiles_per_chunk - 1)
        def _finalize():
            o_ref[0, 0, :, :] = sq_acc[...]
            o_ref[0, 1, :, :] = s_acc[...]

    return kernel


def dice_loss(inputs, targets, smooth=1.0):
    """Pallas-backed DiceLoss.forward. `targets` is unused (module bug kept)."""
    del targets  # reproduced quirk: targets = inputs.view(-1) in the original

    flat = inputs.reshape(-1)   # free for contiguous inputs; native dtype kept
    n = flat.shape[0]
    if n == 0:
        return jnp.float32(0.0)  # dice == smooth/smooth == 1

    # Lane padding only when n is not 128-aligned.  The pad value saturates
    # the tanh-based sigmoid to exactly 0, so padded elements contribute
    # nothing; lane-aligned inputs incur no pad (and no HBM copy) at all.
    pad = (-n) % _LANES
    if pad:
        flat = jnp.pad(flat, (0, pad), constant_values=_PAD_VALUE)
    rows = flat.shape[0] // _LANES
    x2d = flat.reshape(rows, _LANES)

    tile_rows = min(_MAX_TILE_ROWS, _round_up(rows, _SLAB_ROWS))
    total_tiles = pl.cdiv(rows, tile_rows)
    # Two independent partial-sum streams when the tile count splits evenly;
    # otherwise a single chunk so no block is ever clamped / re-read.
    # TODO(synk): on v7x, pltpu.CORE_PARALLEL on the chunk axis would pin the
    # two chunks to the two TensorCores explicitly.
    num_chunks = 2 if (total_tiles % 2 == 0) else 1
    tiles_per_chunk = total_tiles // num_chunks

    kernel = _make_dice_kernel(rows, tile_rows, tiles_per_chunk, total_tiles)

    partials = pl.pallas_call(
        kernel,
        out_shape=jax.ShapeDtypeStruct(
            (num_chunks, 2, _SLAB_ROWS, _LANES), jnp.float32),
        grid_spec=pltpu.PrefetchScalarGridSpec(
            num_scalar_prefetch=0,
            grid=(num_chunks, tiles_per_chunk),
            in_specs=[pl.BlockSpec(
                (tile_rows, _LANES),
                lambda c, i: (c * tiles_per_chunk + i, 0))],
            out_specs=pl.BlockSpec(
                (1, 2, _SLAB_ROWS, _LANES),
                lambda c, i: (c, 0, 0, 0)),
            scratch_shapes=[pltpu.VMEM((_SLAB_ROWS, _LANES), jnp.float32),
                            pltpu.VMEM((_SLAB_ROWS, _LANES), jnp.float32)],
        ),
        compiler_params=pltpu.CompilerParams(
            dimension_semantics=("parallel", "arbitrary"),
        ),
    )(x2d)

    # Single tiny cross-lane/cross-sublane reduce + dice arithmetic (wrapper).
    sums = jnp.sum(partials, axis=(0, 2, 3))   # [sum(s*s), sum(s)]
    inter = sums[0]
    total = sums[1] + sums[1]                  # inputs.sum() + targets.sum()
    dice = (2.0 * inter + smooth) / (total + smooth)
    return 1.0 - dice


def _reference_dice_loss(inputs, targets, smooth=1.0):
    """Pure-JAX reference reproducing the exact PyTorch forward (incl. the bug)."""
    s = jax.nn.sigmoid(inputs.astype(jnp.float32)).reshape(-1)
    t = s  # targets = inputs.view(-1) after sigmoid
    inter = jnp.sum(s * t)
    dice = (2.0 * inter + smooth) / (jnp.sum(s) + jnp.sum(t) + smooth)
    return 1.0 - dice


if __name__ == "__main__":
    key = jax.random.PRNGKey(0)
    k1, k2, k3, k4 = jax.random.split(key, 4)

    # Primary: binary-segmentation logits / masks, NCHW, small spec shape.
    x = jax.random.normal(k1, (2, 1, 16, 16), dtype=jnp.float32)             # logits
    y = (jax.random.uniform(k2, (2, 1, 16, 16)) > 0.5).astype(jnp.float32)   # masks (unused per module bug)
    loss = jax.block_until_ready(dice_loss(x, y, smooth=1.0))
    ref = _reference_dice_loss(x, y, smooth=1.0)
    assert jnp.allclose(loss, ref, atol=1e-4, rtol=1e-4), (loss, ref)

    # Lane-ragged shape: exercises the exact-zero pad + masked tail slab.
    x2 = jax.random.normal(k3, (2, 1, 17, 19), dtype=jnp.float32)
    loss2 = jax.block_until_ready(dice_loss(x2, x2, smooth=1.0))
    ref2 = _reference_dice_loss(x2, x2, smooth=1.0)
    assert jnp.allclose(loss2, ref2, atol=1e-4, rtol=1e-4), (loss2, ref2)

    # Multi-block shape: exercises the unmasked hot loop, both chunks and the
    # statically-masked ragged final block.
    x3 = jax.random.normal(k4, (1, 1, 8196, 128), dtype=jnp.float32)
    loss3 = jax.block_until_ready(dice_loss(x3, x3, smooth=1.0))
    ref3 = _reference_dice_loss(x3, x3, smooth=1.0)
    assert jnp.allclose(loss3, ref3, atol=1e-4, rtol=1e-4), (loss3, ref3)

    print("KERNEL_OK")
</pallas_src>

<mosaic_0001>
module attributes {stable_mosaic.version = 11 : i64} {
  func.func @kernel(%arg0: i32, %arg1: i32, %arg2: memref<8x128xf32, #tpu.memory_space<vmem>>, %arg3: memref<1x2x8x128xf32, #tpu.memory_space<vmem>>, %arg4: memref<8x128xf32, #tpu.memory_space<vmem>>, %arg5: memref<8x128xf32, #tpu.memory_space<vmem>>) attributes {dimension_semantics = [#tpu.dimension_semantics<parallel>, #tpu.dimension_semantics<arbitrary>], iteration_bounds = array<i64: 1, 1>, scalar_prefetch = 0 : i64, scratch_operands = 2 : i64, tpu.core_type = #tpu.core_type<tc>, window_params = [{transform_indices = @transform_0, window_bounds = array<i64: 8, 128>}, {transform_indices = @transform_1, window_bounds = array<i64: 1, 2, 8, 128>}]} {
    %c0_i32 = arith.constant 0 : i32
    %0 = arith.cmpi eq, %arg1, %c0_i32 : i32
    %1 = arith.extui %0 : i1 to i32
    %c0_i32_0 = arith.constant 0 : i32
    %2 = arith.cmpi ne, %1, %c0_i32_0 : i32
    scf.if %2 {
      %cst_6 = arith.constant 0.000000e+00 : f32
      %13 = vector.broadcast %cst_6 : f32 to vector<8x128xf32>
      %c0 = arith.constant 0 : index
      %c0_7 = arith.constant 0 : index
      %14 = vector.load %arg4[%c0, %c0_7] : memref<8x128xf32, #tpu.memory_space<vmem>>, vector<8x128xf32>
      tpu.vector_store %arg4[%c0, %c0_7], %13 {strides = array<i32>} : memref<8x128xf32, #tpu.memory_space<vmem>>, vector<8x128xf32>,
      %cst_8 = arith.constant 0.000000e+00 : f32
      %15 = vector.broadcast %cst_8 : f32 to vector<8x128xf32>
      %c0_9 = arith.constant 0 : index
      %c0_10 = arith.constant 0 : index
      %16 = vector.load %arg5[%c0_9, %c0_10] : memref<8x128xf32, #tpu.memory_space<vmem>>, vector<8x128xf32>
      tpu.vector_store %arg5[%c0_9, %c0_10], %15 {strides = array<i32>} : memref<8x128xf32, #tpu.memory_space<vmem>>, vector<8x128xf32>,
    } else {
    }
    %c1_i32 = arith.constant 1 : i32
    %3 = arith.muli %arg0, %c1_i32 : i32
    %4 = arith.addi %3, %arg1 : i32
    %cst = arith.constant 0.000000e+00 : f32
    %5 = vector.broadcast %cst : f32 to vector<8x128xf32>
    %cst_1 = arith.constant 0.000000e+00 : f32
    %6 = vector.broadcast %cst_1 : f32 to vector<8x128xf32>
    %c0_i32_2 = arith.constant 0 : i32
    %7 = arith.cmpi eq, %4, %c0_i32_2 : i32
    %8 = arith.extui %7 : i1 to i32
    %c0_i32_3 = arith.constant 0 : i32
    %9 = arith.cmpi ne, %8, %c0_i32_3 : i32
    scf.if %9 {
      %c0 = arith.constant 0 : index
      %c0_6 = arith.constant 0 : index
      %13 = vector.load %arg2[%c0, %c0_6] : memref<8x128xf32, #tpu.memory_space<vmem>>, vector<8x128xf32>
      %cst_7 = arith.constant 5.000000e-01 : f32
      %14 = vector.broadcast %cst_7 : f32 to vector<8x128xf32>
      %15 = arith.mulf %14, %13 : vector<8x128xf32>
      %16 = math.tanh %15 : vector<8x128xf32>
      %cst_8 = arith.constant 5.000000e-01 : f32
      %17 = vector.broadcast %cst_8 : f32 to vector<8x128xf32>
      %18 = arith.mulf %17, %16 : vector<8x128xf32>
      %cst_9 = arith.constant 5.000000e-01 : f32
      %19 = vector.broadcast %cst_9 : f32 to vector<8x128xf32>
      %20 = arith.addf %18, %19 : vector<8x128xf32>
      %21 = tpu.iota {dimensions = array<i32: 0>} : vector<8x128xi32>
      %c4_i32 = arith.constant 4 : i32
      %22 = vector.broadcast %c4_i32 : i32 to vector<8x128xi32>
      %23 = arith.cmpi slt, %21, %22 : vector<8x128xi32>
      %cst_10 = arith.constant 0.000000e+00 : f32
      %24 = vector.broadcast %cst_10 : f32 to vector<8x128xf32>
      %25 = arith.select %23, %20, %24 : vector<8x128xi1>, vector<8x128xf32>
      %26 = arith.mulf %25, %25 : vector<8x128xf32>
      %27 = arith.addf %5, %26 : vector<8x128xf32>
      %28 = arith.addf %6, %25 : vector<8x128xf32>
      %c0_11 = arith.constant 0 : index
      %c0_12 = arith.constant 0 : index
      %29 = vector.load %arg4[%c0_11, %c0_12] : memref<8x128xf32, #tpu.memory_space<vmem>>, vector<8x128xf32>
      %30 = arith.addf %29, %27 : vector<8x128xf32>
      %c0_13 = arith.constant 0 : index
      %c0_14 = arith.constant 0 : index
      %31 = vector.load %arg4[%c0_13, %c0_14] : memref<8x128xf32, #tpu.memory_space<vmem>>, vector<8x128xf32>
      tpu.vector_store %arg4[%c0_13, %c0_14], %30 {strides = array<i32>} : memref<8x128xf32, #tpu.memory_space<vmem>>, vector<8x128xf32>,
      %c0_15 = arith.constant 0 : index
      %c0_16 = arith.constant 0 : index
      %32 = vector.load %arg5[%c0_15, %c0_16] : memref<8x128xf32, #tpu.memory_space<vmem>>, vector<8x128xf32>
      %33 = arith.addf %32, %28 : vector<8x128xf32>
      %c0_17 = arith.constant 0 : index
      %c0_18 = arith.constant 0 : index
      %34 = vector.load %arg5[%c0_17, %c0_18] : memref<8x128xf32, #tpu.memory_space<vmem>>, vector<8x128xf32>
      tpu.vector_store %arg5[%c0_17, %c0_18], %33 {strides = array<i32>} : memref<8x128xf32, #tpu.memory_space<vmem>>, vector<8x128xf32>,
    } else {
    }
    %c0_i32_4 = arith.constant 0 : i32
    %10 = arith.cmpi eq, %arg1, %c0_i32_4 : i32
    %11 = arith.extui %10 : i1 to i32
    %c0_i32_5 = arith.constant 0 : i32
    %12 = arith.cmpi ne, %11, %c0_i32_5 : i32
    scf.if %12 {
      %c0 = arith.constant 0 : index
      %c0_6 = arith.constant 0 : index
      %13 = vector.load %arg4[%c0, %c0_6] : memref<8x128xf32, #tpu.memory_space<vmem>>, vector<8x128xf32>
      %c0_7 = arith.constant 0 : index
      %c0_8 = arith.constant 0 : index
      %c0_9 = arith.constant 0 : index
      %c0_10 = arith.constant 0 : index
      %14 = vector.load %arg3[%c0_7, %c0_8, %c0_9, %c0_10] : memref<1x2x8x128xf32, #tpu.memory_space<vmem>>, vector<1x1x8x128xf32>
      %15 = vector.shape_cast %14 : vector<1x1x8x128xf32> to vector<8x128xf32>
      %16 = vector.shape_cast %13 : vector<8x128xf32> to vector<1x1x8x128xf32>
      tpu.vector_store %arg3[%c0_7, %c0_8, %c0_9, %c0_10], %16 {strides = array<i32>} : memref<1x2x8x128xf32, #tpu.memory_space<vmem>>, vector<1x1x8x128xf32>,
      %c0_11 = arith.constant 0 : index
      %c0_12 = arith.constant 0 : index
      %17 = vector.load %arg5[%c0_11, %c0_12] : memref<8x128xf32, #tpu.memory_space<vmem>>, vector<8x128xf32>
      %c0_13 = arith.constant 0 : index
      %c1 = arith.constant 1 : index
      %c0_14 = arith.constant 0 : index
      %c0_15 = arith.constant 0 : index
      %18 = vector.load %arg3[%c0_13, %c1, %c0_14, %c0_15] : memref<1x2x8x128xf32, #tpu.memory_space<vmem>>, vector<1x1x8x128xf32>
      %19 = vector.shape_cast %18 : vector<1x1x8x128xf32> to vector<8x128xf32>
      %20 = vector.shape_cast %17 : vector<8x128xf32> to vector<1x1x8x128xf32>
      tpu.vector_store %arg3[%c0_13, %c1, %c0_14, %c0_15], %20 {strides = array<i32>} : memref<1x2x8x128xf32, #tpu.memory_space<vmem>>, vector<1x1x8x128xf32>,
    } else {
    }
    return
  }
  func.func @transform_0(%arg0: i32, %arg1: i32) -> (i32, i32) {
    %c1_i32 = arith.constant 1 : i32
    %0 = arith.muli %arg0, %c1_i32 : i32
    %1 = arith.addi %0, %arg1 : i32
    %c0_i32 = arith.constant 0 : i32
    %c0_i32_0 = arith.constant 0 : i32
    return %1, %c0_i32 : i32, i32
  }
  func.func @transform_1(%arg0: i32, %arg1: i32) -> (i32, i32, i32, i32) {
    %c0_i32 = arith.constant 0 : i32
    %c0_i32_0 = arith.constant 0 : i32
    %c0_i32_1 = arith.constant 0 : i32
    %c0_i32_2 = arith.constant 0 : i32
    return %arg0, %c0_i32, %c0_i32_0, %c0_i32_1 : i32, i32, i32, i32
  }
}

</mosaic_0001>

<bundles_post_ra>
// kernel: tpu_custom_call.1
= control target key start
LH: loop header
LB: loop body
LE: loop exit
PB: predicated region body
PF: predicated region fallthrough
CT: control target
= control target key end

     0   :  { %6 = vsyncpa [#allocation5], 0  ;;  %s163_s0 = inlined_call_operand.hbm [shape: f32[4,128], index: 0, kind: input, shape index: {}]   ;;  %s164_s1 = inlined_call_operand.hbm [shape: f32[1,2,8,128], index: 1, kind: output, shape index: {}]  }
   0x1   :  { %7 = vsyncpa [#allocation6], 0 }
   0x2   :  { %16 = vsyncadd [#allocation5], 64  ;;  %s141_s6 = smov [#allocation4]  }
   0x3   :  { %s21_s7 = sshll.u32 %s141_s6, 4  ;;  %s22_s7 = int_to_ptr.vmem [resolvable:$true] %s21_s7 }
   0x4   :  { %s105_s8 = scalar_lea.vmem %s22_s7, 64  ;;  %s109_s9 = scalar_lea.vmem %s22_s7, 128 }
   0x5   :  { %p106_p0 = scmp.ne.s32.totalorder %s22_s7, %s105_s8  ;;  %p110_p1 = scmp.lt.s32.totalorder %s22_s7, %s22_s7 }
   0x6   :  { %p111_p2 = scmp.lt.s32.totalorder %s109_s9, %s105_s8 }
   0x8   :  { %p112_p3 = por %p111_p2, %p110_p1 }
   0xa   :  { %p113_p4 = pnand %p112_p3, %p106_p0 }
   0xc   :  { %116 = shalt.err (!%p113_p4)
}
   0xd   :  { %s142_s10 = smov 64   ;;  %s143_s11 = smov 4  }
   0xe   :  { %27 = dma.hbm_to_vmem [thread:$0]  %s163_s0, 64, %s22_s7, [#allocation5], %s142_s10, %s142_s10, %s143_s11  }
   0xf   :  { %137 = dma.done.wait [#allocation5], 128  }
  0x10   :  { %138 = vsyncadd [#allocation5], 4294967168  ;;  %v46_v0 = vld [vmem:[#allocation4] sm:$0xff]  ;;  %v51_v2 = vlaneseq  ;;  %s144_s14 = smov [#allocation7]  }
  0x11   :  { %v47_v1 = vmul.f32 0.5, %v46_v0  ;;  %s77_s15 = sshll.u32 %s144_s14, 4  ;;  %s78_s15 = int_to_ptr.vmem [resolvable:$true] %s77_s15 }
  0x12   :  { %v52_v3 = vshrl.u32 %v51_v2, 7  ;;  %s117_s16 = scalar_lea.vmem %s78_s15, 256  ;;  %p122_p6 = scmp.lt.s32.totalorder %s78_s15, %s78_s15 }
  0x13   :  { %95 = vtanh.f32 %v47_v1  ;;  %p118_p5 = scmp.ne.s32.totalorder %s78_s15, %s117_s16  ;;  %p123_p7 = scmp.lt.s32.totalorder %s117_s16, %s117_s16 }
  0x14   :  { %vm53_vm0 = vcmp.lt.s32.totalorder %v52_v3, 4 }
  0x15   :  { %p124_p8 = por %p123_p7, %p122_p6 }
  0x17   :  { %p125_p9 = pnand %p124_p8, %p118_p5 }
  0x20   :  { %v96_v4 = vpop.eup %95 }
  0x21   :  { %v49_v5 = vmul.f32 0.5, %v96_v4 }
  0x23   :  { %v50_v6 = vadd.f32 0.5, %v49_v5 }
  0x25   :  { %v54_v7 = vsel %vm53_vm0, %v50_v6, 0.0 }
  0x26   :  { %v55_v8 = vmul.f32 %v54_v7, %v54_v7  ;;  %71 = vst [vmem:[#allocation7 + $0x8] sm:$0xff] %v54_v7 }
  0x28   :  { %68 = vst [vmem:[#allocation7] sm:$0xff] %v55_v8 }
  0x29   :  { %128 = shalt.err (!%p125_p9)
}
  0x2a   :  { %s145_s0 = smov 128   ;;  %s146_s17 = smov 8  }
  0x2b   :  { %83 = dma.vmem_to_hbm [thread:$0]  %s78_s15, 256, %s164_s1, [#allocation6], %s145_s0, %s145_s0, %s146_s17  }
  0x2c   :  { %139 = dma.done.wait [#allocation6], 256  }
  0x2d   :  { %140 = vsyncadd [#allocation6], 4294967040 }
  0x2e   :  { %87 = vsyncpa [#allocation5], 1 }
  0x2f   :  { %88 = vsyncpa [#allocation6], 1 }

</bundles_post_ra>
